<compile_context>
chip_gen: v7x
topology: tpu7x:2x2x1
jax: 0.10.0
libtpu: 0.0.40
codegen_flags: <defaults>
</compile_context>

<pallas_src>
import functools

import jax
import jax.numpy as jnp
from jax.experimental import pallas as pl
from jax.experimental.pallas import tpu as pltpu


# ------------------------------------------------------------------
# GELU (tanh approximation) — same helper used in kernel and reference.
# ------------------------------------------------------------------
def _gelu_tanh(x):
    c = 0.7978845608028654  # sqrt(2/pi)
    return 0.5 * x * (1.0 + jnp.tanh(c * (x + 0.044715 * x * x * x)))


# ------------------------------------------------------------------
# Fused FFN kernel: one grid step = (row tile i, hidden tile h)
#   hid  = gelu(x_i @ W1[:, h] + b1[h])          (bf16 in, f32 math)
#   acc += hid @ W2[h, :]                        (f32 accumulator in VMEM)
#   on last h: out_i = acc + b2
# ------------------------------------------------------------------
def _ffn_kernel(x_ref, w1_ref, b1_ref, w2_ref, b2_ref, o_ref, acc_ref):
    h = pl.program_id(1)

    @pl.when(h == 0)
    def _():
        acc_ref[...] = jnp.zeros_like(acc_ref)

    # First linear for this hidden tile (MXU, f32 accumulation) + bias + GELU.
    pre = jnp.dot(x_ref[...], w1_ref[...], preferred_element_type=jnp.float32)
    pre = pre + b1_ref[...].astype(jnp.float32)
    hid = _gelu_tanh(pre)

    # Second linear: accumulate this hidden tile's contribution to the output.
    acc_ref[...] += jnp.dot(
        hid.astype(jnp.bfloat16), w2_ref[...], preferred_element_type=jnp.float32
    )

    @pl.when(h == pl.num_programs(1) - 1)
    def _():
        o_ref[...] = (acc_ref[...] + b2_ref[...].astype(jnp.float32)).astype(
            o_ref.dtype
        )


# ------------------------------------------------------------------
# Tile selection helpers
# ------------------------------------------------------------------
def _pick_tile(size, preferred, multiple):
    """Largest tile <= preferred that divides `size` and is a multiple of
    `multiple`; falls back to the full extent (always legal for BlockSpec)."""
    if size <= preferred:
        return size
    t = (preferred // multiple) * multiple
    while t >= multiple:
        if size % t == 0:
            return t
        t -= multiple
    return size


def _default_tiles():
    vmem_bytes = 128 * 1024 * 1024
    try:
        vmem_bytes = pltpu.get_tpu_info().vmem_capacity_bytes
    except Exception:
        pass
    if vmem_bytes <= 64 * 1024 * 1024:
        return 256, 512  # v7x-class: half the VMEM -> smaller row tile
    return 512, 512      # v5e / v6e: bigger tiles hide DMA better


# ------------------------------------------------------------------
# Full module forward
# ------------------------------------------------------------------
def feedforward_forward(x, params, *, tm=None, th=None):
    """x: (b, n, dim) float32.  params: PyTorch-layout FeedForward weights."""
    b, n, dim = x.shape
    w1 = params["w1"]   # (hidden, dim)
    b1 = params["b1"]   # (hidden,)
    w2 = params["w2"]   # (dim, hidden)
    b2 = params["b2"]   # (dim,)
    hidden = w1.shape[0]

    M = b * n
    tm_pref, th_pref = _default_tiles()
    tm = _pick_tile(M, tm or tm_pref, 8)          # sublane axis of x / out
    th = _pick_tile(hidden, th or th_pref, 128)   # lane axis of W1 / reduction
    grid = (M // tm, hidden // th)

    # bf16 MXU inputs; biases stay f32 (added in the f32 accumulator).
    x2d = x.reshape(M, dim).astype(jnp.bfloat16)
    w1_kn = w1.T.astype(jnp.bfloat16)             # (dim, hidden)
    w2_kn = w2.T.astype(jnp.bfloat16)             # (hidden, dim)
    b1_2d = b1.reshape(1, hidden).astype(jnp.float32)
    b2_2d = b2.reshape(1, dim).astype(jnp.float32)

    out2d = pl.pallas_call(
        _ffn_kernel,
        out_shape=jax.ShapeDtypeStruct((M, dim), jnp.float32),
        grid_spec=pltpu.PrefetchScalarGridSpec(
            num_scalar_prefetch=0,
            grid=grid,
            in_specs=[
                pl.BlockSpec((tm, dim), lambda i, h: (i, 0)),   # x rows
                pl.BlockSpec((dim, th), lambda i, h: (0, h)),   # W1 column tile
                pl.BlockSpec((1, th), lambda i, h: (0, h)),     # b1 tile
                pl.BlockSpec((th, dim), lambda i, h: (h, 0)),   # W2 row tile
                pl.BlockSpec((1, dim), lambda i, h: (0, 0)),    # b2
            ],
            out_specs=pl.BlockSpec((tm, dim), lambda i, h: (i, 0)),
            scratch_shapes=[pltpu.VMEM((tm, dim), jnp.float32)],
        ),
        compiler_params=pltpu.CompilerParams(
            dimension_semantics=("parallel", "arbitrary"),
            vmem_limit_bytes=48 * 1024 * 1024,
        ),
    )(x2d, w1_kn, b1_2d, w2_kn, b2_2d)

    return out2d.reshape(b, n, dim)


# ------------------------------------------------------------------
# Parameter init (deterministic, nn.Linear-shaped) + reference + demo
# ------------------------------------------------------------------
def init_params(key, dim, hidden_dim):
    k1, k2, k3, k4 = jax.random.split(key, 4)
    bound1 = 1.0 / (dim ** 0.5)
    bound2 = 1.0 / (hidden_dim ** 0.5)
    return {
        "w1": jax.random.uniform(k1, (hidden_dim, dim), jnp.float32, -bound1, bound1),
        "b1": jax.random.uniform(k2, (hidden_dim,), jnp.float32, -bound1, bound1),
        "w2": jax.random.uniform(k3, (dim, hidden_dim), jnp.float32, -bound2, bound2),
        "b2": jax.random.uniform(k4, (dim,), jnp.float32, -bound2, bound2),
    }


def reference_forward(x, params):
    """Pure-JAX reference mirroring the kernel's bf16 compute dtypes."""
    f32 = jnp.float32
    xb = x.astype(jnp.bfloat16).astype(f32)
    w1 = params["w1"].astype(jnp.bfloat16).astype(f32)
    w2 = params["w2"].astype(jnp.bfloat16).astype(f32)
    b1 = params["b1"].astype(f32)
    b2 = params["b2"].astype(f32)
    h = _gelu_tanh(jnp.einsum("bnk,hk->bnh", xb, w1) + b1)
    h = h.astype(jnp.bfloat16).astype(f32)          # kernel feeds bf16 hidden to MXU
    return jnp.einsum("bnh,oh->bno", h, w2) + b2


if __name__ == "__main__":
    batch, seq, dim, hidden_dim = 2, 8, 32, 64

    key = jax.random.PRNGKey(0)
    kx, kp = jax.random.split(key)
    x = jax.random.normal(kx, (batch, seq, dim), jnp.float32)
    params = init_params(kp, dim, hidden_dim)

    out = feedforward_forward(x, params)
    out = jax.block_until_ready(out)

    ref = reference_forward(x, params)
    assert out.shape == (batch, seq, dim)
    assert jnp.allclose(out, ref, atol=1e-2, rtol=1e-2), "mismatch vs reference"

    print("KERNEL_OK")
</pallas_src>

<mosaic_0001>
module attributes {stable_mosaic.version = 11 : i64} {
  func.func @_ffn_kernel(%arg0: i32, %arg1: i32, %arg2: memref<16x32xbf16, #tpu.memory_space<vmem>>, %arg3: memref<32x64xbf16, #tpu.memory_space<vmem>>, %arg4: memref<1x64xf32, #tpu.memory_space<vmem>>, %arg5: memref<64x32xbf16, #tpu.memory_space<vmem>>, %arg6: memref<1x32xf32, #tpu.memory_space<vmem>>, %arg7: memref<16x32xf32, #tpu.memory_space<vmem>>, %arg8: memref<16x32xf32, #tpu.memory_space<vmem>>) attributes {dimension_semantics = [#tpu.dimension_semantics<parallel>, #tpu.dimension_semantics<arbitrary>], iteration_bounds = array<i64: 1, 1>, scalar_prefetch = 0 : i64, scratch_operands = 1 : i64, tpu.core_type = #tpu.core_type<tc>, window_params = [{transform_indices = @transform_0, window_bounds = array<i64: 16, 32>}, {transform_indices = @transform_1, window_bounds = array<i64: 32, 64>}, {transform_indices = @transform_2, window_bounds = array<i64: 1, 64>}, {transform_indices = @transform_3, window_bounds = array<i64: 64, 32>}, {pipeline_mode = #tpu.pipeline_mode<synchronous>, transform_indices = @transform_4, window_bounds = array<i64: 1, 32>}, {transform_indices = @transform_5, window_bounds = array<i64: 16, 32>}]} {
    %c0_i32 = arith.constant 0 : i32
    %0 = arith.cmpi eq, %arg1, %c0_i32 : i32
    %1 = arith.extui %0 : i1 to i32
    %c0_i32_0 = arith.constant 0 : i32
    %2 = arith.cmpi ne, %1, %c0_i32_0 : i32
    scf.if %2 {
      %cst_19 = arith.constant 0.000000e+00 : f32
      %31 = vector.broadcast %cst_19 : f32 to vector<16x32xf32>
      %c0_20 = arith.constant 0 : index
      %c0_21 = arith.constant 0 : index
      %32 = vector.load %arg8[%c0_20, %c0_21] : memref<16x32xf32, #tpu.memory_space<vmem>>, vector<16x32xf32>
      tpu.vector_store %arg8[%c0_20, %c0_21], %31 {strides = array<i32>} : memref<16x32xf32, #tpu.memory_space<vmem>>, vector<16x32xf32>,
    } else {
    }
    %c0 = arith.constant 0 : index
    %c0_1 = arith.constant 0 : index
    %3 = vector.load %arg2[%c0, %c0_1] : memref<16x32xbf16, #tpu.memory_space<vmem>>, vector<16x32xbf16>
    %c0_2 = arith.constant 0 : index
    %c0_3 = arith.constant 0 : index
    %4 = vector.load %arg3[%c0_2, %c0_3] : memref<32x64xbf16, #tpu.memory_space<vmem>>, vector<32x64xbf16>
    %cst = arith.constant dense<0.000000e+00> : vector<16x64xf32>
    %5 = tpu.matmul %3, %4, %cst {dimension_numbers = #tpu.dot_dimension_numbers<[1], [0], [0], [1], [0, 0, 1, 1], [], []>} : vector<16x32xbf16>, vector<32x64xbf16>, vector<16x64xf32> -> vector<16x64xf32>
    %c0_4 = arith.constant 0 : index
    %c0_5 = arith.constant 0 : index
    %6 = vector.load %arg4[%c0_4, %c0_5] : memref<1x64xf32, #tpu.memory_space<vmem>>, vector<1x64xf32>
    %7 = vector.broadcast %6 : vector<1x64xf32> to vector<16x64xf32>
    %8 = arith.addf %5, %7 : vector<16x64xf32>
    %cst_6 = arith.constant 5.000000e-01 : f32
    %9 = vector.broadcast %cst_6 : f32 to vector<16x64xf32>
    %10 = arith.mulf %9, %8 : vector<16x64xf32>
    %cst_7 = arith.constant 4.471500e-02 : f32
    %11 = vector.broadcast %cst_7 : f32 to vector<16x64xf32>
    %12 = arith.mulf %11, %8 : vector<16x64xf32>
    %13 = arith.mulf %12, %8 : vector<16x64xf32>
    %14 = arith.mulf %13, %8 : vector<16x64xf32>
    %15 = arith.addf %8, %14 : vector<16x64xf32>
    %cst_8 = arith.constant 0.797884583 : f32
    %16 = vector.broadcast %cst_8 : f32 to vector<16x64xf32>
    %17 = arith.mulf %16, %15 : vector<16x64xf32>
    %18 = math.tanh %17 : vector<16x64xf32>
    %cst_9 = arith.constant 1.000000e+00 : f32
    %19 = vector.broadcast %cst_9 : f32 to vector<16x64xf32>
    %20 = arith.addf %19, %18 : vector<16x64xf32>
    %21 = arith.mulf %10, %20 : vector<16x64xf32>
    %c0_10 = arith.constant 0 : index
    %c0_11 = arith.constant 0 : index
    %22 = vector.load %arg8[%c0_10, %c0_11] : memref<16x32xf32, #tpu.memory_space<vmem>>, vector<16x32xf32>
    %23 = arith.truncf %21 : vector<16x64xf32> to vector<16x64xbf16>
    %c0_12 = arith.constant 0 : index
    %c0_13 = arith.constant 0 : index
    %24 = vector.load %arg5[%c0_12, %c0_13] : memref<64x32xbf16, #tpu.memory_space<vmem>>, vector<64x32xbf16>
    %cst_14 = arith.constant dense<0.000000e+00> : vector<16x32xf32>
    %25 = tpu.matmul %23, %24, %cst_14 {dimension_numbers = #tpu.dot_dimension_numbers<[1], [0], [0], [1], [0, 0, 1, 1], [], []>} : vector<16x64xbf16>, vector<64x32xbf16>, vector<16x32xf32> -> vector<16x32xf32>
    %26 = arith.addf %22, %25 : vector<16x32xf32>
    %c0_15 = arith.constant 0 : index
    %c0_16 = arith.constant 0 : index
    %27 = vector.load %arg8[%c0_15, %c0_16] : memref<16x32xf32, #tpu.memory_space<vmem>>, vector<16x32xf32>
    tpu.vector_store %arg8[%c0_15, %c0_16], %26 {strides = array<i32>} : memref<16x32xf32, #tpu.memory_space<vmem>>, vector<16x32xf32>,
    %c0_i32_17 = arith.constant 0 : i32
    %28 = arith.cmpi eq, %arg1, %c0_i32_17 : i32
    %29 = arith.extui %28 : i1 to i32
    %c0_i32_18 = arith.constant 0 : i32
    %30 = arith.cmpi ne, %29, %c0_i32_18 : i32
    scf.if %30 {
      %c0_19 = arith.constant 0 : index
      %c0_20 = arith.constant 0 : index
      %31 = vector.load %arg8[%c0_19, %c0_20] : memref<16x32xf32, #tpu.memory_space<vmem>>, vector<16x32xf32>
      %c0_21 = arith.constant 0 : index
      %c0_22 = arith.constant 0 : index
      %32 = vector.load %arg6[%c0_21, %c0_22] : memref<1x32xf32, #tpu.memory_space<vmem>>, vector<1x32xf32>
      %33 = vector.broadcast %32 : vector<1x32xf32> to vector<16x32xf32>
      %34 = arith.addf %31, %33 : vector<16x32xf32>
      %c0_23 = arith.constant 0 : index
      %c0_24 = arith.constant 0 : index
      %35 = vector.load %arg7[%c0_23, %c0_24] : memref<16x32xf32, #tpu.memory_space<vmem>>, vector<16x32xf32>
      tpu.vector_store %arg7[%c0_23, %c0_24], %34 {strides = array<i32>} : memref<16x32xf32, #tpu.memory_space<vmem>>, vector<16x32xf32>,
    } else {
    }
    return
  }
  func.func @transform_0(%arg0: i32, %arg1: i32) -> (i32, i32) {
    %c0_i32 = arith.constant 0 : i32
    %c0_i32_0 = arith.constant 0 : i32
    return %arg0, %c0_i32 : i32, i32
  }
  func.func @transform_1(%arg0: i32, %arg1: i32) -> (i32, i32) {
    %c0_i32 = arith.constant 0 : i32
    %c0_i32_0 = arith.constant 0 : i32
    return %c0_i32, %arg1 : i32, i32
  }
  func.func @transform_2(%arg0: i32, %arg1: i32) -> (i32, i32) {
    %c0_i32 = arith.constant 0 : i32
    %c0_i32_0 = arith.constant 0 : i32
    return %c0_i32, %arg1 : i32, i32
  }
  func.func @transform_3(%arg0: i32, %arg1: i32) -> (i32, i32) {
    %c0_i32 = arith.constant 0 : i32
    %c0_i32_0 = arith.constant 0 : i32
    return %arg1, %c0_i32 : i32, i32
  }
  func.func @transform_4(%arg0: i32, %arg1: i32) -> (i32, i32) {
    %c0_i32 = arith.constant 0 : i32
    %c0_i32_0 = arith.constant 0 : i32
    %c0_i32_1 = arith.constant 0 : i32
    return %c0_i32, %c0_i32_0 : i32, i32
  }
  func.func @transform_5(%arg0: i32, %arg1: i32) -> (i32, i32) {
    %c0_i32 = arith.constant 0 : i32
    %c0_i32_0 = arith.constant 0 : i32
    return %arg0, %c0_i32 : i32, i32
  }
}

</mosaic_0001>

<bundles_post_ra>
// kernel: tpu_custom_call.1
= control target key start
LH: loop header
LB: loop body
LE: loop exit
PB: predicated region body
PF: predicated region fallthrough
CT: control target
= control target key end

     0   :  { %v317_v1 = vmov 0.0   ;;  %vm318_vm0 = vmmov 0   ;;  %vm26_vm1 = vcmask 261120   ;;  %s398_s0 = inlined_call_operand.vmem [shape: bf16[16,32], index: 0, kind: input, shape index: {}]   ;;  %s399_s1 = inlined_call_operand.vmem [shape: bf16[32,64], index: 1, kind: input, shape index: {}]   ;;  %s400_s2 = inlined_call_operand.vmem [shape: f32[1,64], index: 2, kind: input, shape index: {}]   ;;  %s401_s3 = inlined_call_operand.vmem [shape: bf16[64,32], index: 3, kind: input, shape index: {}]   ;;  %s402_s4 = inlined_call_operand.vmem [shape: f32[1,32], index: 4, kind: input, shape index: {}]   ;;  %s403_s5 = inlined_call_operand.hbm [shape: f32[16,32], index: 5, kind: output, shape index: {}]  }
   0x1   :  { %v282_v0 = vld [vmem:[%s399_s1] sm:$0xff]   ;;  %257 = vmatprep.subr.bf16.mxu0 %v317_v1  ;;  %265 = vmatprep.subr.bf16.mxu1 %v317_v1  ;;  %v283_v2 = vld [vmem:[%s399_s1 + $0x8] sm:$0xff]   ;;  %27 = vst.msk [vmem:[#allocation2] sm:$0xff] %vm26_vm1, %v317_v1  ;;  %28 = vst.msk [vmem:[#allocation2 + $0x8] sm:$0xff] %vm26_vm1, %v317_v1 }
   0x2   :  { %258 = vmatpush3.bf16.msra.mxu0 %v282_v0  ;;  %261 = vmatprep.mubr.msk.bf16.mxu0 %vm318_vm0, %v317_v1  ;;  %v284_v3 = vld [vmem:[%s398_s0] sm:$0xff]  }
   0x3   :  { %259 = vmatprep.subr.bf16.mxu0 %v317_v1  ;;  %273 = vmatprep.mubr.msk.bf16.mxu1 %vm318_vm0, %v317_v1 }
   0x6   :  { %260 = vmatpush3.bf16.msra.mxu0 %v283_v2 }
   0x7   :  { %10 = vsyncpa [#allocation4], 0  ;;  %v285_v4 = vld [vmem:[%s401_s3] sm:$0xff]   ;;  %v286_v5 = vld [vmem:[%s401_s3 + $0x8] sm:$0xff]   ;;  %vm157_vm2 = vcmask 523264   ;;  %s319_s7 = smov [#allocation3]  }
   0x8   :  { %266 = vmatpush3.bf16.msra.mxu1 %v285_v4  ;;  %v287_v6 = vld [vmem:[%s401_s3 + $0x10] sm:$0xff]   ;;  %v288_v7 = vld [vmem:[%s401_s3 + $0x18] sm:$0xff]   ;;  %v238_v8 = vld [vmem:[%s400_s2] ss:$0 sm:$0xff]  ;;  %s227_s8 = sshll.u32 %s319_s7, 4  ;;  %s228_s8 = int_to_ptr.vmem [resolvable:$true] %s227_s8 }
   0x9   :  { %262 = vmatmul.mubr.msk.bf16.vlgmr.msra.gmra.mrb[0].mxu0 %vm26_vm1, %v284_v3  ;;  %267 = vmatprep.subr.bf16.mxu1 %v317_v1  ;;  %v122_v34 = vld [vmem:[#allocation2] sm:$0xff]  ;;  %v123_v36 = vld [vmem:[#allocation2 + $0x8] sm:$0xff]  ;;  %s293_s9 = scalar_lea.vmem %s228_s8, 256  ;;  %p298_p1 = scmp.lt.s32.totalorder %s228_s8, %s228_s8 }
   0xa   :  { %v248_v42 = vld [vmem:[%s402_s4] ss:$0 sm:$0xff]  ;;  %p294_p0 = scmp.ne.s32.totalorder %s228_s8, %s293_s9  ;;  %p299_p2 = scmp.lt.s32.totalorder %s293_s9, %s293_s9 }
   0xc   :  { %268 = vmatpush3.bf16.msra.mxu1 %v286_v5  ;;  %p300_p3 = por %p299_p2, %p298_p1 }
   0xd   :  { %269 = vmatprep.subr.bf16.mxu1 %v317_v1 }
   0xe   :  { %p301_p4 = pnand %p300_p3, %p294_p0 }
  0x10   :  { %270 = vmatpush3.bf16.msra.mxu1 %v287_v6 }
  0x11   :  { %271 = vmatprep.subr.bf16.mxu1 %v317_v1 }
  0x14   :  { %272 = vmatpush3.bf16.msra.mxu1 %v288_v7 }
  0xdc   :  { %v97_v9 = vpop.f32.mrb[0].mxu0 }
  0xdd   :  { %v98_v10 = vadd.f32 %v238_v8, %v97_v9  ;;  %v263_v11 = vpop.f32.mrb[1].mxu0 }
  0xde   :  { %v100_v12 = vpop.f32.mrb[2].mxu0 }
  0xdf   :  { %v106_v13 = vmul.f32 0.044715, %v98_v10  ;;  %v101_v14 = vadd.f32 %v238_v8, %v100_v12  ;;  %v264_v15 = vpop.f32.mrb[3].mxu0  ;;  %v104_v28 = vmul.f32 0.5, %v98_v10 }
  0xe1   :  { %v108_v16 = vmul.f32 %v106_v13, %v98_v10  ;;  %v107_v17 = vmul.f32 0.044715, %v101_v14  ;;  %v105_v29 = vmul.f32 0.5, %v101_v14 }
  0xe3   :  { %v110_v18 = vmul.f32 %v108_v16, %v98_v10  ;;  %v109_v19 = vmul.f32 %v107_v17, %v101_v14 }
  0xe5   :  { %v112_v20 = vadd.f32 %v110_v18, %v98_v10  ;;  %v111_v21 = vmul.f32 %v109_v19, %v101_v14 }
  0xe7   :  { %v114_v22 = vmul.f32 0.7978846, %v112_v20  ;;  %v113_v23 = vadd.f32 %v111_v21, %v101_v14 }
  0xe9   :  { %289 = vtanh.f32 %v114_v22  ;;  %v115_v24 = vmul.f32 0.7978846, %v113_v23 }
  0xeb   :  { %291 = vtanh.f32 %v115_v24 }
  0xf3   :  { %v290_v25 = vpop.eup %289 }
  0xf4   :  { %v118_v26 = vadd.f32 1.0, %v290_v25 }
  0xf5   :  { %v292_v27 = vpop.eup %291 }
  0xf6   :  { %v119_v30 = vadd.f32 1.0, %v292_v27  ;;  %v120_v31 = vmul.f32 %v118_v26, %v104_v28 }
  0xf8   :  { %v121_v32 = vmul.f32 %v119_v30, %v105_v29 }
  0xfa   :  { %v124_v33 = vpack.c.bf16 %v121_v32, %v120_v31 }
  0xfc   :  { %274 = vmatmul.mubr.msk.bf16.vlgmr.msra.gmra.mrb[0].mxu1 %vm157_vm2, %v124_v33 }
 0x1cf   :  { %v195_v35 = vpop.f32.mrb[0].mxu1 }
 0x1d0   :  { %v202_v37 = vadd.f32 %v195_v35, %v122_v34  ;;  %v275_v38 = vpop.f32.mrb[1].mxu1 }
 0x1d1   :  { %v198_v39 = vpop.f32.mrb[2].mxu1 }
 0x1d2   :  { %204 = vst.msk [vmem:[#allocation2] sm:$0xff] %vm26_vm1, %v202_v37  ;;  %v203_v40 = vadd.f32 %v198_v39, %v123_v36  ;;  %v276_v41 = vpop.f32.mrb[3].mxu1 }
 0x1d4   :  { %205 = vst.msk [vmem:[#allocation2 + $0x8] sm:$0xff] %vm26_vm1, %v203_v40 }
 0x1d9   :  { %v209_v43 = vld [vmem:[#allocation2] sm:$0xff] }
 0x1da   :  { %v218_v44 = vadd.f32 %v248_v42, %v209_v43 }
 0x1db   :  { %v210_v45 = vld [vmem:[#allocation2 + $0x8] sm:$0xff] }
 0x1dc   :  { %v219_v46 = vadd.f32 %v248_v42, %v210_v45  ;;  %220 = vst.msk [vmem:[#allocation3] sm:$0xff] %vm26_vm1, %v218_v44 }
 0x1de   :  { %221 = vst.msk [vmem:[#allocation3 + $0x8] sm:$0xff] %vm26_vm1, %v219_v46 }
 0x1df   :  { %304 = shalt.err (!%p301_p4)
}
 0x1e0   :  { %s305_s11 = scalar_lea.hbm %s403_s5, 256 }
 0x1e1   :  { %p306_p5 = scmp.ne.s32.totalorder %s403_s5, %s305_s11  ;;  %p309_p6 = scmp.lt.u32.totalorder %s305_s11, %s403_s5 }
 0x1e3   :  { %p311_p7 = pnand %p309_p6, %p306_p5 }
 0x1e5   :  { %314 = shalt.err (!%p311_p7)
}
 0x1e6   :  { %s320_s16 = smov 128   ;;  %s321_s17 = smov 8  }
 0x1e7   :  { %233 = dma.vmem_to_hbm [thread:$0]  %s228_s8, 256, %s403_s5, [#allocation4], %s320_s16, %s320_s16, %s321_s17  }
 0x1e8   :  { %315 = dma.done.wait [#allocation4], 256  }
 0x1e9   :  { %316 = vsyncadd [#allocation4], 4294967040 }
 0x1ea   :  { %237 = vsyncpa [#allocation4], 1 }

</bundles_post_ra>
